<compile_context>
chip_gen: v7x
topology: tpu7x:2x2x1
jax: 0.10.0
libtpu: 0.0.40
codegen_flags: <defaults>
</compile_context>

<pallas_src>
import functools

import jax
import jax.numpy as jnp
from jax.experimental import pallas as pl
from jax.experimental.pallas import tpu as pltpu


def _halting_kernel(scores_ref, all_ice_ref, packed_ref, *, stop_threshold):
    """Per B-tile (scores_ref is [A, TB, T], T on lanes):
         all_ice      = max over answers                      [TB, T]
         should_stop  = (all_ice >= thr); forced True at t=T-1
         halt         = first True timestep                   [TB, 1]
         packed slab  : cols 0..A-1 = scores at halt, col A = ice at halt,
                        col A+1 = halt index (as f32)         [TB, 128]
    """
    A, TB, T = scores_ref.shape
    L = packed_ref.shape[-1]                       # 128-lane dense output slab

    # Per-answer [TB, T] slabs (static slice on the leading axis is free).
    s = [scores_ref[a] for a in range(A)]

    # Max over answers: pure elementwise VPU work, lane-dense.
    all_ice = functools.reduce(jnp.maximum, s)
    all_ice_ref[...] = all_ice

    # Halting decision: threshold (>=, as in torch) + force last timestep True.
    t_iota = jax.lax.broadcasted_iota(jnp.int32, (TB, T), 1)
    should_stop = jnp.logical_or(all_ice >= stop_threshold, t_iota == T - 1)

    # First True timestep (== torch argmax of should_stop.float()).
    halt = jnp.min(jnp.where(should_stop, t_iota, T), axis=-1, keepdims=True)

    # Gather at the halting timestep via one-hot lane reductions (XLU slot,
    # otherwise idle here).  sel_ice == max_a sel[a] exactly -> no extra
    # multiply/reduction for it.
    onehot = (t_iota == halt).astype(jnp.float32)
    sel = [jnp.sum(onehot * s[a], axis=-1, keepdims=True) for a in range(A)]
    sel_ice = functools.reduce(jnp.maximum, sel)
    halt_f = halt.astype(jnp.float32)              # exact for T < 2**24

    # Pack the tiny outputs into one lane-dense [TB, 128] slab (unmasked store).
    lane = jax.lax.broadcasted_iota(jnp.int32, (TB, L), 1)
    packed = jnp.zeros((TB, L), jnp.float32)
    for a in range(A):
        packed = jnp.where(lane == a, sel[a], packed)
    packed = jnp.where(lane == A, sel_ice, packed)
    packed = jnp.where(lane == A + 1, halt_f, packed)
    packed_ref[...] = packed


def _pick_block_b(B, T, A, budget_bytes=24 * 1024 * 1024):
    """B-tile size: large enough to amortize per-step overhead, small enough
    that the double-buffered I/O blocks *plus* the in-kernel [TB, T] f32
    temporaries stay well under the 48 MiB scoped-VMEM limit (v7x has only
    64 MiB physical VMEM; v5e/v6e have 128 MiB)."""
    # 2x-buffered input block + 2x-buffered outputs + ~6 [*, T] f32 temporaries.
    per_row = 2 * (A * T + T + 128) * 4 + 6 * T * 4
    tb = budget_bytes // max(1, per_row)
    tb = max(8, min(4096, (tb // 8) * 8))
    if B >= 32:
        # Keep >= ~4 grid steps: feeds both v7x TensorCores and the pipeline.
        tb = min(tb, max(8, ((B // 4) // 8) * 8))
    if B < tb:
        tb = B                                     # full-dim block is legal
    return tb


@functools.partial(jax.jit, static_argnames=("stop_threshold",))
def quality_classifier_forward(all_scores, stop_threshold):
    """JAX equivalent of QualityClassifier._forward when `cache` is provided.

    Args:
      all_scores: f32[B, T, A] cached per-timestep answer probabilities.
      stop_threshold: python float (static).
    Returns: dict matching the PyTorch module's output dict.
    """
    all_scores = jnp.asarray(all_scores, dtype=jnp.float32)
    B, T, A = all_scores.shape
    assert A + 2 <= 128, "packed output slab holds A scores + ice + halt"

    TB = _pick_block_b(B, T, A)
    grid_b = pl.cdiv(B, TB)

    # Single relayout so the answer axis leads and T sits on lanes.  No pad:
    # Pallas masks the boundary block.  allow_input_fusion lets XLA fold this
    # transpose into the kernel's input DMA when possible.
    scores_abt = jnp.transpose(all_scores, (2, 0, 1))            # [A, B, T]

    kernel = functools.partial(_halting_kernel,
                               stop_threshold=float(stop_threshold))

    all_ice, packed = pl.pallas_call(
        kernel,
        out_shape=(
            jax.ShapeDtypeStruct((B, T), jnp.float32),    # all_is_correct_estimation
            jax.ShapeDtypeStruct((B, 128), jnp.float32),  # packed: scores|ice|halt
        ),
        grid=(grid_b,),
        in_specs=[
            pl.BlockSpec((A, TB, T), lambda i: (0, i, 0)),
        ],
        out_specs=(
            pl.BlockSpec((TB, T), lambda i: (i, 0)),
            pl.BlockSpec((TB, 128), lambda i: (i, 0)),
        ),
        compiler_params=pltpu.CompilerParams(
            dimension_semantics=("parallel",),        # shard B across TCs
            vmem_limit_bytes=48 * 1024 * 1024,        # safe on v5e/v6e/v7x
            allow_input_fusion=[True],                # let XLA fuse the transpose
        ),
    )(scores_abt)

    sel_scores = packed[:, :A]                        # [B, A]
    sel_ice = packed[:, A]                            # [B]
    halt = packed[:, A + 1].astype(jnp.int32)         # [B]

    return {
        'scores': sel_scores,
        'halt_timesteps': halt,
        'is_correct_estimation': sel_ice,
        'all_scores': all_scores,
        'all_is_correct_estimation': all_ice,
    }


def _reference(all_scores, stop_threshold):
    """Pure-JAX reference mirroring the torch tensor math."""
    all_ice = jnp.max(all_scores, axis=-1)
    should_stop = all_ice >= stop_threshold
    should_stop = should_stop.at[:, -1].set(True)
    halt = jnp.argmax(should_stop.astype(jnp.float32), axis=-1)
    b = jnp.arange(all_scores.shape[0])
    return {
        'scores': all_scores[b, halt],
        'halt_timesteps': halt,
        'is_correct_estimation': all_ice[b, halt],
        'all_scores': all_scores,
        'all_is_correct_estimation': all_ice,
    }


def _check(out, ref):
    assert jnp.allclose(out['all_is_correct_estimation'],
                        ref['all_is_correct_estimation'], atol=1e-6)
    assert jnp.array_equal(out['halt_timesteps'].astype(jnp.int32),
                           ref['halt_timesteps'].astype(jnp.int32))
    assert jnp.allclose(out['scores'], ref['scores'], atol=1e-6)
    assert jnp.allclose(out['is_correct_estimation'],
                        ref['is_correct_estimation'], atol=1e-6)


if __name__ == "__main__":
    key = jax.random.PRNGKey(0)

    # Deterministic synthetic "cache": positive scores normalized over answers,
    # mimicking `answers_prob / answers_prob.sum()` in the torch module.
    def make_scores(k, B, T, A):
        raw = jax.random.uniform(k, (B, T, A), dtype=jnp.float32) + 1e-3
        return raw / jnp.sum(raw, axis=-1, keepdims=True)

    # Case 1: tiny shape matching the module's 4-answer (A/B/C/D) setup.
    B, T, A = 2, 8, 4
    all_scores = make_scores(key, B, T, A)
    out = quality_classifier_forward(all_scores, 0.6)
    jax.block_until_ready(out)
    _check(out, _reference(all_scores, 0.6))

    # Case 2: batch not divisible by the B-tile -> exercises boundary masking.
    k2 = jax.random.PRNGKey(1)
    B2, T2, A2 = 36, 8, 4
    all_scores2 = make_scores(k2, B2, T2, A2)
    out2 = quality_classifier_forward(all_scores2, 0.3)
    jax.block_until_ready(out2)
    _check(out2, _reference(all_scores2, 0.3))

    print("KERNEL_OK")
</pallas_src>

<mosaic_0001>
module attributes {stable_mosaic.version = 11 : i64} {
  func.func @_halting_kernel(%arg0: i32, %arg1: memref<4x2x8xf32, #tpu.memory_space<vmem>>, %arg2: memref<2x8xf32, #tpu.memory_space<vmem>>, %arg3: memref<2x128xf32, #tpu.memory_space<vmem>>) attributes {dimension_semantics = [#tpu.dimension_semantics<parallel>], iteration_bounds = array<i64: 1>, scalar_prefetch = 0 : i64, scratch_operands = 0 : i64, tpu.core_type = #tpu.core_type<tc>, window_params = [{transform_indices = @transform_0, window_bounds = array<i64: 4, 2, 8>}, {transform_indices = @transform_1, window_bounds = array<i64: 2, 8>}, {transform_indices = @transform_2, window_bounds = array<i64: 2, 128>}]} {
    %c0 = arith.constant 0 : index
    %c0_0 = arith.constant 0 : index
    %c0_1 = arith.constant 0 : index
    %0 = vector.load %arg1[%c0, %c0_0, %c0_1] : memref<4x2x8xf32, #tpu.memory_space<vmem>>, vector<1x2x8xf32>
    %1 = vector.shape_cast %0 : vector<1x2x8xf32> to vector<2x8xf32>
    %c1 = arith.constant 1 : index
    %c0_2 = arith.constant 0 : index
    %c0_3 = arith.constant 0 : index
    %2 = vector.load %arg1[%c1, %c0_2, %c0_3] : memref<4x2x8xf32, #tpu.memory_space<vmem>>, vector<1x2x8xf32>
    %3 = vector.shape_cast %2 : vector<1x2x8xf32> to vector<2x8xf32>
    %c2 = arith.constant 2 : index
    %c0_4 = arith.constant 0 : index
    %c0_5 = arith.constant 0 : index
    %4 = vector.load %arg1[%c2, %c0_4, %c0_5] : memref<4x2x8xf32, #tpu.memory_space<vmem>>, vector<1x2x8xf32>
    %5 = vector.shape_cast %4 : vector<1x2x8xf32> to vector<2x8xf32>
    %c3 = arith.constant 3 : index
    %c0_6 = arith.constant 0 : index
    %c0_7 = arith.constant 0 : index
    %6 = vector.load %arg1[%c3, %c0_6, %c0_7] : memref<4x2x8xf32, #tpu.memory_space<vmem>>, vector<1x2x8xf32>
    %7 = vector.shape_cast %6 : vector<1x2x8xf32> to vector<2x8xf32>
    %8 = arith.maximumf %1, %3 : vector<2x8xf32>
    %9 = arith.maximumf %8, %5 : vector<2x8xf32>
    %10 = arith.maximumf %9, %7 : vector<2x8xf32>
    %c0_8 = arith.constant 0 : index
    %c0_9 = arith.constant 0 : index
    %11 = vector.load %arg2[%c0_8, %c0_9] : memref<2x8xf32, #tpu.memory_space<vmem>>, vector<2x8xf32>
    tpu.vector_store %arg2[%c0_8, %c0_9], %10 {strides = array<i32>} : memref<2x8xf32, #tpu.memory_space<vmem>>, vector<2x8xf32>,
    %12 = tpu.iota {dimensions = array<i32: 1>} : vector<2x8xi32>
    %cst = arith.constant 6.000000e-01 : f32
    %13 = vector.broadcast %cst : f32 to vector<2x8xf32>
    %14 = arith.cmpf oge, %10, %13 : vector<2x8xf32>
    %c7_i32 = arith.constant 7 : i32
    %15 = vector.broadcast %c7_i32 : i32 to vector<2x8xi32>
    %16 = arith.cmpi eq, %12, %15 : vector<2x8xi32>
    %17 = arith.ori %14, %16 : vector<2x8xi1>
    %c8_i32 = arith.constant 8 : i32
    %18 = vector.broadcast %c8_i32 : i32 to vector<2x8xi32>
    %19 = arith.select %17, %12, %18 : vector<2x8xi1>, vector<2x8xi32>
    %cst_10 = arith.constant dense<2147483647> : vector<2xi32>
    %20 = vector.multi_reduction <minsi>, %19, %cst_10 [1] : vector<2x8xi32> to vector<2xi32>
    %21 = vector.shape_cast %20 : vector<2xi32> to vector<2x1xi32>
    %22 = vector.broadcast %21 : vector<2x1xi32> to vector<2x8xi32>
    %23 = arith.cmpi eq, %12, %22 : vector<2x8xi32>
    %24 = arith.extui %23 : vector<2x8xi1> to vector<2x8xi32>
    %25 = arith.sitofp %24 : vector<2x8xi32> to vector<2x8xf32>
    %26 = arith.mulf %25, %1 : vector<2x8xf32>
    %cst_11 = arith.constant dense<0.000000e+00> : vector<2xf32>
    %27 = vector.multi_reduction <add>, %26, %cst_11 [1] : vector<2x8xf32> to vector<2xf32>
    %28 = vector.shape_cast %27 : vector<2xf32> to vector<2x1xf32>
    %29 = arith.mulf %25, %3 : vector<2x8xf32>
    %cst_12 = arith.constant dense<0.000000e+00> : vector<2xf32>
    %30 = vector.multi_reduction <add>, %29, %cst_12 [1] : vector<2x8xf32> to vector<2xf32>
    %31 = vector.shape_cast %30 : vector<2xf32> to vector<2x1xf32>
    %32 = arith.mulf %25, %5 : vector<2x8xf32>
    %cst_13 = arith.constant dense<0.000000e+00> : vector<2xf32>
    %33 = vector.multi_reduction <add>, %32, %cst_13 [1] : vector<2x8xf32> to vector<2xf32>
    %34 = vector.shape_cast %33 : vector<2xf32> to vector<2x1xf32>
    %35 = arith.mulf %25, %7 : vector<2x8xf32>
    %cst_14 = arith.constant dense<0.000000e+00> : vector<2xf32>
    %36 = vector.multi_reduction <add>, %35, %cst_14 [1] : vector<2x8xf32> to vector<2xf32>
    %37 = vector.shape_cast %36 : vector<2xf32> to vector<2x1xf32>
    %38 = arith.maximumf %28, %31 : vector<2x1xf32>
    %39 = arith.maximumf %38, %34 : vector<2x1xf32>
    %40 = arith.maximumf %39, %37 : vector<2x1xf32>
    %41 = arith.sitofp %21 : vector<2x1xi32> to vector<2x1xf32>
    %42 = tpu.iota {dimensions = array<i32: 1>} : vector<2x128xi32>
    %cst_15 = arith.constant 0.000000e+00 : f32
    %43 = vector.broadcast %cst_15 : f32 to vector<2x128xf32>
    %c0_i32 = arith.constant 0 : i32
    %44 = vector.broadcast %c0_i32 : i32 to vector<2x128xi32>
    %45 = arith.cmpi eq, %42, %44 : vector<2x128xi32>
    %46 = vector.shape_cast %28 : vector<2x1xf32> to vector<2x1xf32>
    %47 = vector.broadcast %46 : vector<2x1xf32> to vector<2x128xf32>
    %48 = arith.select %45, %47, %43 : vector<2x128xi1>, vector<2x128xf32>
    %c1_i32 = arith.constant 1 : i32
    %49 = vector.broadcast %c1_i32 : i32 to vector<2x128xi32>
    %50 = arith.cmpi eq, %42, %49 : vector<2x128xi32>
    %51 = vector.shape_cast %31 : vector<2x1xf32> to vector<2x1xf32>
    %52 = vector.broadcast %51 : vector<2x1xf32> to vector<2x128xf32>
    %53 = arith.select %50, %52, %48 : vector<2x128xi1>, vector<2x128xf32>
    %c2_i32 = arith.constant 2 : i32
    %54 = vector.broadcast %c2_i32 : i32 to vector<2x128xi32>
    %55 = arith.cmpi eq, %42, %54 : vector<2x128xi32>
    %56 = vector.shape_cast %34 : vector<2x1xf32> to vector<2x1xf32>
    %57 = vector.broadcast %56 : vector<2x1xf32> to vector<2x128xf32>
    %58 = arith.select %55, %57, %53 : vector<2x128xi1>, vector<2x128xf32>
    %c3_i32 = arith.constant 3 : i32
    %59 = vector.broadcast %c3_i32 : i32 to vector<2x128xi32>
    %60 = arith.cmpi eq, %42, %59 : vector<2x128xi32>
    %61 = vector.shape_cast %37 : vector<2x1xf32> to vector<2x1xf32>
    %62 = vector.broadcast %61 : vector<2x1xf32> to vector<2x128xf32>
    %63 = arith.select %60, %62, %58 : vector<2x128xi1>, vector<2x128xf32>
    %c4_i32 = arith.constant 4 : i32
    %64 = vector.broadcast %c4_i32 : i32 to vector<2x128xi32>
    %65 = arith.cmpi eq, %42, %64 : vector<2x128xi32>
    %66 = vector.shape_cast %40 : vector<2x1xf32> to vector<2x1xf32>
    %67 = vector.broadcast %66 : vector<2x1xf32> to vector<2x128xf32>
    %68 = arith.select %65, %67, %63 : vector<2x128xi1>, vector<2x128xf32>
    %c5_i32 = arith.constant 5 : i32
    %69 = vector.broadcast %c5_i32 : i32 to vector<2x128xi32>
    %70 = arith.cmpi eq, %42, %69 : vector<2x128xi32>
    %71 = vector.shape_cast %41 : vector<2x1xf32> to vector<2x1xf32>
    %72 = vector.broadcast %71 : vector<2x1xf32> to vector<2x128xf32>
    %73 = arith.select %70, %72, %68 : vector<2x128xi1>, vector<2x128xf32>
    %c0_16 = arith.constant 0 : index
    %c0_17 = arith.constant 0 : index
    %74 = vector.load %arg3[%c0_16, %c0_17] : memref<2x128xf32, #tpu.memory_space<vmem>>, vector<2x128xf32>
    tpu.vector_store %arg3[%c0_16, %c0_17], %73 {strides = array<i32>} : memref<2x128xf32, #tpu.memory_space<vmem>>, vector<2x128xf32>,
    return
  }
  func.func @transform_0(%arg0: i32) -> (i32, i32, i32) {
    %c0_i32 = arith.constant 0 : i32
    %c0_i32_0 = arith.constant 0 : i32
    %c0_i32_1 = arith.constant 0 : i32
    return %c0_i32, %arg0, %c0_i32_0 : i32, i32, i32
  }
  func.func @transform_1(%arg0: i32) -> (i32, i32) {
    %c0_i32 = arith.constant 0 : i32
    %c0_i32_0 = arith.constant 0 : i32
    return %arg0, %c0_i32 : i32, i32
  }
  func.func @transform_2(%arg0: i32) -> (i32, i32) {
    %c0_i32 = arith.constant 0 : i32
    %c0_i32_0 = arith.constant 0 : i32
    return %arg0, %c0_i32 : i32, i32
  }
}

</mosaic_0001>

<bundles_post_ra>
// kernel: quality_classifier_forward.2
= control target key start
LH: loop header
LB: loop body
LE: loop exit
PB: predicated region body
PF: predicated region fallthrough
CT: control target
= control target key end

     0   :  { %s198_s0 = inlined_call_operand.vmem [shape: f32[2,8,4], index: 0, kind: input, shape index: {}]   ;;  %s199_s1 = inlined_call_operand.hbm [shape: f32[2,8], index: 1, kind: output, shape index: {0}]   ;;  %s200_s2 = inlined_call_operand.vmem [shape: f32[2,128], index: 2, kind: output, shape index: {1}]  }
   0x1   :  { %v11_v0 = vld [vmem:[%s198_s0] sm:$0xff]  }
   0x2   :  { %8 = vsyncpa [#allocation3], 0  ;;  %13 = vst [vmem:[#allocation4] sm:$0xff] %v11_v0   ;;  %v41_v1 = vlaneseq  ;;  %vm39_vm1 = vcmask 58368   ;;  %v146_v23 = vmov 0.0   ;;  %s147_s0 = smov [#allocation2]  }
   0x3   :  { %s104_s11 = sshll.u32 %s147_s0, 4  ;;  %s105_s11 = int_to_ptr.vmem [resolvable:$true] %s104_s11 }
   0x4   :  { %v166_v6 = vand.u32 127, %v41_v1  ;;  %s122_s12 = scalar_lea.vmem %s105_s11, 32  ;;  %p127_p1 = scmp.lt.s32.totalorder %s105_s11, %s105_s11 }
   0x5   :  { %p123_p0 = scmp.ne.s32.totalorder %s105_s11, %s122_s12  ;;  %p128_p2 = scmp.lt.s32.totalorder %s122_s12, %s122_s12 }
   0x6   :  { %vm44_vm0 = vcmp.eq.s32.totalorder %v166_v6, 7 }
   0x7   :  { %p129_p3 = por %p128_p2, %p127_p1 }
   0x9   :  { %v29_v2 = vld [vmem:[#allocation4] sm:$0x3]  ;;  %v31_v3 = vld [vmem:[#allocation4 + $0x2] sm:$0x3]  ;;  %v33_v4 = vld [vmem:[#allocation4 + $0x4] sm:$0x3]  ;;  %p130_p4 = pnand %p129_p3, %p123_p0 }
   0xa   :  { %v36_v5 = vmax.f32 %v29_v2, %v31_v3  ;;  %v35_v7 = vld [vmem:[#allocation4 + $0x6] sm:$0x3] }
   0xc   :  { %v37_v8 = vmax.f32 %v36_v5, %v33_v4 }
   0xe   :  { %v38_v9 = vmax.f32 %v37_v8, %v35_v7 }
  0x10   :  { %vm43_vm2 = vcmp.ge.f32.partialorder %v38_v9, 0.6  ;;  %40 = vst.msk [vmem:[#allocation2] sm:$0x3] %vm39_vm1, %v38_v9 }
  0x11   :  { %vm45_vm3 = vmor %vm43_vm2, %vm44_vm0 }
  0x12   :  { %v46_v10 = vsel %vm45_vm3, %v166_v6, 8 }
  0x13   :  { %v47_v11 = vsel %vm39_vm1, %v46_v10, 2147483647 }
  0x14   :  { %v49_v12 = vshra.s32 %v47_v11, 16  ;;  %v48_v14 = vand.u32 65535, %v47_v11 }
  0x16   :  { %v51_v13 = vcvt.s32.f32 %v49_v12  ;;  %v50_v15 = vcvt.s32.f32 %v48_v14 }
  0x18   :  { %52 = vmin.xlane.f32.xlu0 %v51_v13 }
  0xa5   :  { %v53_v16 = vpop.xlane.xlu0 %52 }
  0xa6   :  { %vm54_vm4 = vcmp.eq.f32.partialorder %v51_v13, %v53_v16  ;;  %v59_v18 = vcvt.f32.s32 %v53_v16 }
  0xa7   :  { %v55_v17 = vsel %vm54_vm4, %v50_v15, inf }
  0xa8   :  { %56 = vmin.xlane.f32.xlu0 %v55_v17  ;;  %v60_v20 = vshll.u32 %v59_v18, 16 }
 0x135   :  { %v57_v19 = vpop.xlane.xlu0 %56 }
 0x136   :  { %v58_v21 = vcvt.f32.s32 %v57_v19 }
 0x138   :  { %v61_v22 = vadd.s32 %v60_v20, %v58_v21 }
 0x13a   :  { %vm62_vm5 = vcmp.eq.s32.totalorder %v166_v6, %v61_v22 }
 0x13b   :  { %v119_v24 = vsel %vm62_vm5, 1.0, %v146_v23 }
 0x13c   :  { %v73_v25 = vmul.f32 %v119_v24, %v33_v4  ;;  %v65_v26 = vmul.f32 %v119_v24, %v29_v2  ;;  %v69_v29 = vmul.f32 %v119_v24, %v31_v3  ;;  %v77_v31 = vmul.f32 %v119_v24, %v35_v7 }
 0x13e   :  { %v74_v27 = vsel %vm39_vm1, %v73_v25, 0.0  ;;  %v66_v28 = vsel %vm39_vm1, %v65_v26, 0.0  ;;  %v70_v30 = vsel %vm39_vm1, %v69_v29, 0.0  ;;  %v78_v32 = vsel %vm39_vm1, %v77_v31, 0.0 }
 0x13f   :  { %75 = vadd.xlane.f32.xlu0 %v74_v27  ;;  %67 = vadd.xlane.f32.xlu1 %v66_v28 }
 0x143   :  { %71 = vadd.xlane.f32.xlu1 %v70_v30 }
 0x147   :  { %79 = vadd.xlane.f32.xlu1 %v78_v32 }
 0x148   :  { %133 = shalt.err (!%p130_p4)
}
 0x149   :  { %s134_s15 = scalar_lea.hbm %s199_s1, 32 }
 0x14a   :  { %p135_p5 = scmp.ne.s32.totalorder %s199_s1, %s134_s15  ;;  %p138_p6 = scmp.lt.u32.totalorder %s134_s15, %s199_s1 }
 0x14c   :  { %p140_p7 = pnand %p138_p6, %p135_p5 }
 0x14e   :  { %143 = shalt.err (!%p140_p7)
}
 0x14f   :  { %107 = dma.vmem_to_hbm [thread:$0]  %s105_s11, 32, %s199_s1, [#allocation3]   ;;  %vm85_vm6 = vcmp.eq.s32.totalorder %v166_v6, 0  ;;  %vm87_vm7 = vcmp.eq.s32.totalorder %v166_v6, 1  ;;  %vm89_vm8 = vcmp.eq.s32.totalorder %v166_v6, 2  ;;  %vm91_vm9 = vcmp.eq.s32.totalorder %v166_v6, 3 }
 0x150   :  { %vm93_vm10 = vcmp.eq.s32.totalorder %v166_v6, 4  ;;  %vm95_vm11 = vcmp.eq.s32.totalorder %v166_v6, 5  ;;  %v84_v44 = vcvt.s32.f32 %v61_v22 }
 0x1cc   :  { %v68_v33 = vpop.xlane.xlu1 %67  ;;  %v76_v38 = vpop.xlane.xlu0 %75 }
 0x1cd   :  { %v86_v34 = vsel %vm85_vm6, %v68_v33, 0.0 }
 0x1d0   :  { %v72_v35 = vpop.xlane.xlu1 %71 }
 0x1d1   :  { %v81_v36 = vmax.f32 %v68_v33, %v72_v35  ;;  %v88_v37 = vsel %vm87_vm7, %v72_v35, %v86_v34 }
 0x1d2   :  { %v90_v40 = vsel %vm89_vm8, %v76_v38, %v88_v37 }
 0x1d3   :  { %v82_v39 = vmax.f32 %v81_v36, %v76_v38 }
 0x1d4   :  { %v80_v41 = vpop.xlane.xlu1 %79 }
 0x1d5   :  { %v83_v42 = vmax.f32 %v82_v39, %v80_v41  ;;  %v92_v43 = vsel %vm91_vm9, %v80_v41, %v90_v40 }
 0x1d7   :  { %v94_v45 = vsel %vm93_vm10, %v83_v42, %v92_v43 }
 0x1d8   :  { %v96_v46 = vsel %vm95_vm11, %v84_v44, %v94_v45 }
 0x1d9   :  { %97 = vst [vmem:[%s200_s2] sm:$0x3] %v96_v46 }
 0x1da   :  { %144 = dma.done.wait [#allocation3], 32  }
 0x1db   :  { %145 = vsyncadd [#allocation3], 4294967264 }
 0x1dc   :  { %115 = vsyncpa [#allocation3], 1 }

</bundles_post_ra>
